<compile_context>
chip_gen: v7x
topology: tpu7x:2x2x1
jax: 0.10.0
libtpu: 0.0.40
codegen_flags: <defaults>
</compile_context>

<pallas_src>
import functools

import jax
import jax.numpy as jnp
from jax.experimental import pallas as pl
from jax.experimental.pallas import tpu as pltpu


def _logistic_kernel(x_ref, w_ref, b_ref, o_ref, acc_ref):
    # x_ref: (TM, TK) VMEM, w_ref: (TK, 1) VMEM, b_ref: (1, 1) SMEM scalar,
    # o_ref: (TM, 1) VMEM, acc_ref: (TM, 1) f32 VMEM scratch (resident over k).
    k = pl.program_id(1)

    @pl.when(k == 0)
    def _():
        acc_ref[...] = jnp.zeros_like(acc_ref)

    # Mat-vec with f32 accumulation (MXU path; compute is never the bottleneck
    # here -- the binding resource is the x DMA).
    acc_ref[...] += jnp.dot(
        x_ref[...], w_ref[...], preferred_element_type=jnp.float32
    )

    @pl.when(k == pl.num_programs(1) - 1)
    def _():
        z = acc_ref[...] + b_ref[0, 0]
        o_ref[...] = jax.nn.sigmoid(z).astype(o_ref.dtype)


def _round_up(x, m):
    return ((x + m - 1) // m) * m


@functools.partial(jax.jit, static_argnames=("tm", "tk"))
def logistic_net(x, w, b, *, tm=512, tk=2048):
    """sigmoid(x @ w + b).  x: [B, D], w: [D, 1], b: [1, 1]  ->  [B, 1]."""
    B, D = x.shape

    # Tile sizes: TM multiple of 8 (sublane), TK multiple of 128 (lane).
    TM = min(tm, _round_up(B, 8))
    TK = min(tk, _round_up(D, 128))

    B_pad = _round_up(B, TM)
    D_pad = _round_up(D, TK)

    # Zero-pad remainders (zero rows/cols contribute nothing to the dot).
    if (B_pad, D_pad) != (B, D):
        x = jnp.pad(x, ((0, B_pad - B), (0, D_pad - D)))
    if D_pad != D:
        w = jnp.pad(w, ((0, D_pad - D), (0, 0)))

    grid = (B_pad // TM, D_pad // TK)

    # Explicit scoped-VMEM budget: double-buffered x / w / out tiles + f32 acc,
    # with headroom; clamped to stay well under v7x's 64 MiB physical VMEM.
    itemsize = jnp.dtype(x.dtype).itemsize
    tile_bytes = 2 * (TM * TK + TK + TM) * itemsize + TM * 4
    vmem_limit = int(min(max(2 * tile_bytes, 16 * 1024 * 1024),
                         48 * 1024 * 1024))

    out_padded = pl.pallas_call(
        _logistic_kernel,
        out_shape=jax.ShapeDtypeStruct((B_pad, 1), jnp.float32),
        grid_spec=pltpu.PrefetchScalarGridSpec(
            num_scalar_prefetch=0,
            grid=grid,
            in_specs=[
                pl.BlockSpec((TM, TK), lambda i, k: (i, k)),   # x tile
                pl.BlockSpec((TK, 1), lambda i, k: (k, 0)),    # w resident in i
                pl.BlockSpec(memory_space=pltpu.SMEM),         # bias scalar
            ],
            out_specs=pl.BlockSpec((TM, 1), lambda i, k: (i, 0)),
            scratch_shapes=[pltpu.VMEM((TM, 1), jnp.float32)],
        ),
        compiler_params=pltpu.CompilerParams(
            dimension_semantics=("parallel", "arbitrary"),
            vmem_limit_bytes=vmem_limit,
        ),
    )(x, w, b)

    return out_padded[:B]


def init_params(key, num_inputs):
    # Deterministic init mimicking nn.Linear default: U(-1/sqrt(D), 1/sqrt(D))
    kw, kb = jax.random.split(key)
    bound = 1.0 / jnp.sqrt(jnp.float32(num_inputs))
    w = jax.random.uniform(kw, (num_inputs, 1), jnp.float32, -bound, bound)
    b = jax.random.uniform(kb, (1, 1), jnp.float32, -bound, bound)
    return w, b


if __name__ == "__main__":
    key = jax.random.PRNGKey(0)
    kx, kp, kx2 = jax.random.split(key, 3)

    # Small aligned case.
    batch, num_inputs = 8, 32
    x = jax.random.normal(kx, (batch, num_inputs), jnp.float32)
    w, b = init_params(kp, num_inputs)

    out = logistic_net(x, w, b)
    jax.block_until_ready(out)
    ref = jax.nn.sigmoid(x @ w + b[0, 0])
    assert out.shape == (batch, 1)
    assert jnp.allclose(out, ref, atol=1e-5), "mismatch vs reference (aligned)"

    # Ragged case exercising the batch / feature padding path.
    batch2, num_inputs2 = 13, 100
    x2 = jax.random.normal(kx2, (batch2, num_inputs2), jnp.float32)
    w2, b2 = init_params(kp, num_inputs2)
    out2 = logistic_net(x2, w2, b2)
    jax.block_until_ready(out2)
    ref2 = jax.nn.sigmoid(x2 @ w2 + b2[0, 0])
    assert out2.shape == (batch2, 1)
    assert jnp.allclose(out2, ref2, atol=1e-5), "mismatch vs reference (ragged)"

    print("KERNEL_OK")
</pallas_src>

<mosaic_0001>
module attributes {stable_mosaic.version = 11 : i64} {
  func.func @_logistic_kernel(%arg0: i32, %arg1: i32, %arg2: memref<8x128xf32, #tpu.memory_space<vmem>>, %arg3: memref<128x1xf32, #tpu.memory_space<vmem>>, %arg4: memref<1x1xf32, #tpu.memory_space<smem>>, %arg5: memref<8x1xf32, #tpu.memory_space<vmem>>, %arg6: memref<8x1xf32, #tpu.memory_space<vmem>>) attributes {dimension_semantics = [#tpu.dimension_semantics<parallel>, #tpu.dimension_semantics<arbitrary>], iteration_bounds = array<i64: 1, 1>, scalar_prefetch = 0 : i64, scratch_operands = 1 : i64, tpu.core_type = #tpu.core_type<tc>, window_params = [{transform_indices = @transform_0, window_bounds = array<i64: 8, 128>}, {transform_indices = @transform_1, window_bounds = array<i64: 128, 1>}, {transform_indices = @transform_2, window_bounds = array<i64: 1, 1>}, {transform_indices = @transform_3, window_bounds = array<i64: 8, 1>}]} {
    %c0_i32 = arith.constant 0 : i32
    %0 = arith.cmpi eq, %arg1, %c0_i32 : i32
    %1 = arith.extui %0 : i1 to i32
    %c0_i32_0 = arith.constant 0 : i32
    %2 = arith.cmpi ne, %1, %c0_i32_0 : i32
    scf.if %2 {
      %cst_10 = arith.constant 0.000000e+00 : f32
      %12 = vector.broadcast %cst_10 : f32 to vector<8x1xf32>
      %c0_11 = arith.constant 0 : index
      %c0_12 = arith.constant 0 : index
      %13 = vector.load %arg6[%c0_11, %c0_12] : memref<8x1xf32, #tpu.memory_space<vmem>>, vector<8x1xf32>
      tpu.vector_store %arg6[%c0_11, %c0_12], %12 {strides = array<i32>} : memref<8x1xf32, #tpu.memory_space<vmem>>, vector<8x1xf32>,
    } else {
    }
    %c0 = arith.constant 0 : index
    %c0_1 = arith.constant 0 : index
    %3 = vector.load %arg6[%c0, %c0_1] : memref<8x1xf32, #tpu.memory_space<vmem>>, vector<8x1xf32>
    %c0_2 = arith.constant 0 : index
    %c0_3 = arith.constant 0 : index
    %4 = vector.load %arg2[%c0_2, %c0_3] : memref<8x128xf32, #tpu.memory_space<vmem>>, vector<8x128xf32>
    %c0_4 = arith.constant 0 : index
    %c0_5 = arith.constant 0 : index
    %5 = vector.load %arg3[%c0_4, %c0_5] : memref<128x1xf32, #tpu.memory_space<vmem>>, vector<128x1xf32>
    %cst = arith.constant dense<0.000000e+00> : vector<8x1xf32>
    %6 = tpu.matmul %4, %5, %cst {dimension_numbers = #tpu.dot_dimension_numbers<[1], [0], [0], [1], [0, 0, 1, 1], [], []>} : vector<8x128xf32>, vector<128x1xf32>, vector<8x1xf32> -> vector<8x1xf32>
    %7 = arith.addf %3, %6 : vector<8x1xf32>
    %c0_6 = arith.constant 0 : index
    %c0_7 = arith.constant 0 : index
    %8 = vector.load %arg6[%c0_6, %c0_7] : memref<8x1xf32, #tpu.memory_space<vmem>>, vector<8x1xf32>
    tpu.vector_store %arg6[%c0_6, %c0_7], %7 {strides = array<i32>} : memref<8x1xf32, #tpu.memory_space<vmem>>, vector<8x1xf32>,
    %c0_i32_8 = arith.constant 0 : i32
    %9 = arith.cmpi eq, %arg1, %c0_i32_8 : i32
    %10 = arith.extui %9 : i1 to i32
    %c0_i32_9 = arith.constant 0 : i32
    %11 = arith.cmpi ne, %10, %c0_i32_9 : i32
    scf.if %11 {
      %c0_10 = arith.constant 0 : index
      %c0_11 = arith.constant 0 : index
      %12 = vector.load %arg6[%c0_10, %c0_11] : memref<8x1xf32, #tpu.memory_space<vmem>>, vector<8x1xf32>
      %c0_12 = arith.constant 0 : index
      %c0_13 = arith.constant 0 : index
      %13 = memref.load %arg4[%c0_12, %c0_13] : memref<1x1xf32, #tpu.memory_space<smem>>
      %14 = vector.broadcast %13 : f32 to vector<8x1xf32>
      %15 = arith.addf %12, %14 : vector<8x1xf32>
      %16 = arith.negf %15 : vector<8x1xf32>
      %17 = math.exp %16 : vector<8x1xf32>
      %cst_14 = arith.constant 1.000000e+00 : f32
      %18 = vector.broadcast %cst_14 : f32 to vector<8x1xf32>
      %19 = arith.addf %18, %17 : vector<8x1xf32>
      %20 = arith.divf %18, %19 : vector<8x1xf32>
      %c0_15 = arith.constant 0 : index
      %c0_16 = arith.constant 0 : index
      %21 = vector.load %arg5[%c0_15, %c0_16] : memref<8x1xf32, #tpu.memory_space<vmem>>, vector<8x1xf32>
      tpu.vector_store %arg5[%c0_15, %c0_16], %20 {strides = array<i32>} : memref<8x1xf32, #tpu.memory_space<vmem>>, vector<8x1xf32>,
    } else {
    }
    return
  }
  func.func @transform_0(%arg0: i32, %arg1: i32) -> (i32, i32) {
    %c0_i32 = arith.constant 0 : i32
    return %arg0, %arg1 : i32, i32
  }
  func.func @transform_1(%arg0: i32, %arg1: i32) -> (i32, i32) {
    %c0_i32 = arith.constant 0 : i32
    %c0_i32_0 = arith.constant 0 : i32
    return %arg1, %c0_i32 : i32, i32
  }
  func.func @transform_2(%arg0: i32, %arg1: i32) -> (i32, i32) {
    %c0_i32 = arith.constant 0 : i32
    %c0_i32_0 = arith.constant 0 : i32
    %c0_i32_1 = arith.constant 0 : i32
    return %c0_i32, %c0_i32_0 : i32, i32
  }
  func.func @transform_3(%arg0: i32, %arg1: i32) -> (i32, i32) {
    %c0_i32 = arith.constant 0 : i32
    %c0_i32_0 = arith.constant 0 : i32
    return %arg0, %c0_i32 : i32, i32
  }
}

</mosaic_0001>

<bundles_post_ra>
// kernel: logistic_net.1
= control target key start
LH: loop header
LB: loop body
LE: loop exit
PB: predicated region body
PF: predicated region fallthrough
CT: control target
= control target key end

     0   :  { %vm19_vm0 = vcmask 7168   ;;  %v214_v0 = vmov 0.0|0.0   ;;  %v215_v4 = vmov 0.0   ;;  %vm216_vm1 = vmmov 0   ;;  %s297_s1 = inlined_call_operand.vmem [shape: f32[128,1], index: 1, kind: input, shape index: {}]   ;;  %s298_s0 = inlined_call_operand.vmem [shape: f32[8,128], index: 0, kind: input, shape index: {}]   ;;  %s299_s2 = inlined_call_operand.<no memory space> [shape: f32[1,1], index: 2, kind: input, shape index: {}]   ;;  %s300_s3 = inlined_call_operand.vmem [shape: f32[8,1], index: 3, kind: output, shape index: {}]  }
   0x1   :  { %183 = vmatprep.subr.bf16.mxu0 %v214_v0  ;;  %v23_v1 = vld [vmem:[%s297_s1] sm:$0xff]  ;;  %v24_v2 = vld [vmem:[%s297_s1 + $0x8] sm:$0xff]  ;;  %v25_v3 = vld [vmem:[%s297_s1 + $0x10] sm:$0xff]  ;;  %20 = vst.msk [vmem:[#allocation2] sm:$0xff] %vm19_vm0, %v215_v4  ;;  %180 = vmatprep.mubr.msk.f32.mxu0 %vm216_vm1, %v215_v4  ;;  %v117_v31 = vstv %s299_s2 }
   0x2   :  { %v184_v5 = vpack.c.bf16 %v24_v2, %v23_v1  ;;  %v26_v6 = vld [vmem:[%s297_s1 + $0x18] sm:$0xff]  ;;  %v27_v8 = vld [vmem:[%s297_s1 + $0x20] sm:$0xff]  ;;  %v28_v9 = vld [vmem:[%s297_s1 + $0x28] sm:$0xff] }
   0x3   :  { %v187_v7 = vpack.c.bf16 %v26_v6, %v25_v3  ;;  %v190_v10 = vpack.c.bf16 %v28_v9, %v27_v8  ;;  %v29_v11 = vld [vmem:[%s297_s1 + $0x30] sm:$0xff]  ;;  %v30_v12 = vld [vmem:[%s297_s1 + $0x38] sm:$0xff]  ;;  %v31_v14 = vld [vmem:[%s297_s1 + $0x40] sm:$0xff] }
   0x4   :  { %185 = vmatpush3.bf16.msra.mxu0 %v184_v5  ;;  %v193_v13 = vpack.c.bf16 %v30_v12, %v29_v11  ;;  %v32_v15 = vld [vmem:[%s297_s1 + $0x48] sm:$0xff]  ;;  %v33_v17 = vld [vmem:[%s297_s1 + $0x50] sm:$0xff]  ;;  %v34_v18 = vld [vmem:[%s297_s1 + $0x58] sm:$0xff] }
   0x5   :  { %186 = vmatprep.subr.bf16.mxu0 %v214_v0  ;;  %v196_v16 = vpack.c.bf16 %v32_v15, %v31_v14  ;;  %v199_v19 = vpack.c.bf16 %v34_v18, %v33_v17  ;;  %v35_v20 = vld [vmem:[%s297_s1 + $0x60] sm:$0xff]  ;;  %v36_v21 = vld [vmem:[%s297_s1 + $0x68] sm:$0xff]  ;;  %v37_v23 = vld [vmem:[%s297_s1 + $0x70] sm:$0xff] }
   0x6   :  { %v202_v22 = vpack.c.bf16 %v36_v21, %v35_v20  ;;  %v38_v24 = vld [vmem:[%s297_s1 + $0x78] sm:$0xff]  ;;  %v22_v26 = vld [vmem:[%s298_s0] sm:$0xff] }
   0x7   :  { %v205_v25 = vpack.c.bf16 %v38_v24, %v37_v23 }
   0x8   :  { %188 = vmatpush3.bf16.msra.mxu0 %v187_v7  ;;  %v21_v27 = vld [vmem:[#allocation2] sm:$0xff] }
   0x9   :  { %189 = vmatprep.subr.bf16.mxu0 %v214_v0 }
   0xc   :  { %191 = vmatpush3.bf16.msra.mxu0 %v190_v10 }
   0xd   :  { %192 = vmatprep.subr.bf16.mxu0 %v214_v0 }
  0x10   :  { %194 = vmatpush3.bf16.msra.mxu0 %v193_v13 }
  0x11   :  { %195 = vmatprep.subr.bf16.mxu0 %v214_v0 }
  0x14   :  { %197 = vmatpush3.bf16.msra.mxu0 %v196_v16 }
  0x15   :  { %198 = vmatprep.subr.bf16.mxu0 %v214_v0 }
  0x18   :  { %200 = vmatpush3.bf16.msra.mxu0 %v199_v19 }
  0x19   :  { %201 = vmatprep.subr.bf16.mxu0 %v214_v0 }
  0x1c   :  { %203 = vmatpush3.bf16.msra.mxu0 %v202_v22 }
  0x1d   :  { %204 = vmatprep.subr.bf16.mxu0 %v214_v0 }
  0x20   :  { %206 = vmatpush3.bf16.msra.mxu0 %v205_v25 }
  0x23   :  { %181 = vmatmul.mubr.f32.vlgmr.msra.gmra.mrb[0].mxu0 %v22_v26 }
  0xf6   :  { %v105_v28 = vpop.f32.mrb[0].mxu0 }
  0xf7   :  { %v109_v29 = vadd.f32 %v105_v28, %v21_v27  ;;  %v182_v30 = vpop.f32.mrb[1].mxu0 }
  0xf9   :  { %111 = vst.msk [vmem:[#allocation2] sm:$0xff] %vm19_vm0, %v109_v29 }
 0x100   :  { %v115_v32 = vld [vmem:[#allocation2] sm:$0xff] }
 0x101   :  { %v118_v33 = vadd.f32 %v117_v31, %v115_v32 }
 0x103   :  { %v130_v34 = vmul.f32 -1.442695, %v118_v33 }
 0x105   :  { %210 = vpow2.f32 %v130_v34 }
 0x10f   :  { %v211_v35 = vpop.eup %210 }
 0x110   :  { %v122_v36 = vadd.f32 1.0, %v211_v35 }
 0x112   :  { %212 = vrcp.f32 %v122_v36 }
 0x11c   :  { %v213_v37 = vpop.eup %212 }
 0x11d   :  { %125 = vst.msk [vmem:[%s300_s3] sm:$0xff] %vm19_vm0, %v213_v37 }

</bundles_post_ra>
